<compile_context>
chip_gen: v5e
topology: v5e:2x2
jax: 0.10.0
libtpu: 0.0.40
codegen_flags: <defaults>
</compile_context>

<pallas_src>
import jax
import jax.numpy as jnp
from jax.experimental import pallas as pl
from jax.experimental.pallas import tpu as pltpu


# Double-buffered per-step VMEM footprint target.  v7x has only 64 MiB VMEM
# per TensorCore, so a ~40 MiB budget with a 48 MiB scoped limit is the
# largest setting that is safe on every generation (v5e/v6e: 128 MiB physical).
_VMEM_BUDGET_BYTES = 40 * 1024 * 1024
_VMEM_LIMIT_BYTES = 48 * 1024 * 1024

# Below this output size, kernel dispatch + per-step overhead dominate and
# XLA's fused concat/copy is at parity or faster (also avoids <128-lane stores).
_SMALL_PROBLEM_BYTES = 1 * 1024 * 1024


def _group_all_kernel(xyz_t_ref, feat_ref, out_ref):
    # xyz_t_ref: (bt, 3,   tn)   pre-transposed xyz tile
    # feat_ref:  (bt, C,   tn)
    # out_ref:   (bt, C+3, tn)
    # The channel offset of 3 is not sublane-aligned; the shifted store hides
    # under the HBM-bound DMA traffic on v6e/v7x.
    # TODO(synk): if v5e bundles show vst/XLU binding, realign on the load side
    # (assemble channels 0..7 in-register, store 8-aligned).
    out_ref[:, 0:3, :] = xyz_t_ref[...].astype(out_ref.dtype)
    out_ref[:, 3:, :] = feat_ref[...].astype(out_ref.dtype)


def _pad8(x):
    return -(-x // 8) * 8


def _bytes_per_step(bt, tn, C, itemsize):
    """Double-buffered VMEM bytes for one grid step (sublane-padded tiles)."""
    rows = _pad8(3) + _pad8(C) + _pad8(C + 3)   # xyz + feat + out tiles
    return 2 * bt * rows * tn * itemsize


def _choose_tiles(B, N, C, itemsize):
    """Pick (bt, tn) filling the VMEM budget; keep >=2 grid steps if possible."""
    per_lane = _bytes_per_step(1, 1, C, itemsize)
    max_tn = max(_VMEM_BUDGET_BYTES // per_lane, 1)

    if max_tn >= N:
        # Whole N axis fits in one step: pack batch elements per step to
        # amortize the ~0.35 us/step fixed cost.
        tn = N
        bt = int(min(B, max(1, _VMEM_BUDGET_BYTES
                            // max(_bytes_per_step(1, N, C, itemsize), 1))))
    else:
        # Lane-axis tile: largest multiple of 128 fitting the budget (no cap).
        tn = int(min(N, max(128, (max_tn // 128) * 128)))
        bt = 1

    # Guarantee at least two grid steps along a "parallel" axis so v7x's two
    # TensorCores (sharing 3.2 TB/s HBM) both get work.  No-op on v5e/v6e.
    if pl.cdiv(B, bt) * pl.cdiv(N, tn) < 2:
        if B >= 2:
            bt = -(-B // 2)                          # ceil(B/2) -> 2 batch steps
        elif N >= 256:
            tn = max(128, ((N // 2) // 128) * 128)   # ~N/2, multiple of 128
        # else: single-step; such tiny problems are handled by the fast path.
    return bt, tn


def group_all(xyz, new_xyz=None, features=None, use_xyz=True, *,
              force_kernel=False):
    """JAX/Pallas equivalent of pointnet2_ops GroupAll.forward."""
    del new_xyz  # ignored, as in the reference implementation
    B, N, _ = xyz.shape

    # Wrapper-side transpose: (B, N, 3) -> (B, 3, N).  Tiny traffic; lets the
    # kernel stream lane-dense rows instead of a 3-lane-wide tile.
    xyz_t = jnp.transpose(xyz, (0, 2, 1))

    if features is None:
        # Pure relayout (transpose + unsqueeze); no concat -> no kernel needed.
        return xyz_t[:, :, None, :]

    if not use_xyz:
        # new_features = features.unsqueeze(2): pure reshape, no data movement.
        return features[:, :, None, :]

    C = features.shape[1]
    out_dtype = jnp.promote_types(xyz.dtype, features.dtype)
    itemsize = jnp.dtype(out_dtype).itemsize

    out_bytes = B * (C + 3) * N * itemsize
    if out_bytes < _SMALL_PROBLEM_BYTES and not force_kernel:
        # Small-problem fast path: let XLA's fused concat handle it.
        return jnp.concatenate(
            [xyz_t[:, :, None, :].astype(out_dtype),
             features[:, :, None, :].astype(out_dtype)],
            axis=1,
        )

    bt, tn = _choose_tiles(B, N, C, itemsize)
    grid = (pl.cdiv(B, bt), pl.cdiv(N, tn))

    out = pl.pallas_call(
        _group_all_kernel,
        out_shape=jax.ShapeDtypeStruct((B, C + 3, N), out_dtype),
        grid=grid,
        in_specs=[
            pl.BlockSpec((bt, 3, tn), lambda b, n: (b, 0, n)),
            pl.BlockSpec((bt, C, tn), lambda b, n: (b, 0, n)),
        ],
        out_specs=pl.BlockSpec((bt, C + 3, tn), lambda b, n: (b, 0, n)),
        compiler_params=pltpu.CompilerParams(
            dimension_semantics=("parallel", "parallel"),
            vmem_limit_bytes=_VMEM_LIMIT_BYTES,
        ),
        cost_estimate=pl.CostEstimate(
            flops=0, transcendentals=0,
            bytes_accessed=2 * B * (C + 3) * N * itemsize,
        ),
    )(xyz_t, features)

    # Add the singleton "nsample" dim outside the kernel (free reshape).
    return out[:, :, None, :]


if __name__ == "__main__":
    key = jax.random.PRNGKey(0)
    k1, k2, k3, k4, k5 = jax.random.split(key, 5)

    def ref_group_all(xyz, features):
        return jnp.concatenate(
            [jnp.transpose(xyz, (0, 2, 1))[:, :, None, :],
             features[:, :, None, :]],
            axis=1,
        )

    # 1) Small shapes (routes through the XLA fast path).
    B, N, C = 2, 16, 4
    xyz = jax.random.normal(k1, (B, N, 3), dtype=jnp.float32)
    new_xyz = jax.random.normal(k2, (B, 1, 3), dtype=jnp.float32)  # ignored
    features = jax.random.normal(k3, (B, C, N), dtype=jnp.float32)

    out = jax.block_until_ready(group_all(xyz, new_xyz, features, use_xyz=True))
    assert out.shape == (B, C + 3, 1, N), out.shape
    assert jnp.allclose(out, ref_group_all(xyz, features)), "fast-path mismatch"

    # 2) Pallas kernel path (forced so the kernel is exercised at small shapes).
    B2, N2, C2 = 2, 384, 8
    xyz2 = jax.random.normal(k4, (B2, N2, 3), dtype=jnp.float32)
    feat2 = jax.random.normal(k5, (B2, C2, N2), dtype=jnp.float32)
    out2 = jax.block_until_ready(
        group_all(xyz2, None, feat2, use_xyz=True, force_kernel=True))
    assert out2.shape == (B2, C2 + 3, 1, N2), out2.shape
    assert jnp.allclose(out2, ref_group_all(xyz2, feat2)), "kernel mismatch"

    # 3) xyz-only and use_xyz=False paths (pure relayouts, no kernel).
    out_xyz_only = jax.block_until_ready(group_all(xyz, new_xyz, None))
    assert out_xyz_only.shape == (B, 3, 1, N)
    assert jnp.allclose(out_xyz_only,
                        jnp.transpose(xyz, (0, 2, 1))[:, :, None, :])

    out_no_xyz = jax.block_until_ready(
        group_all(xyz, new_xyz, features, use_xyz=False))
    assert out_no_xyz.shape == (B, C, 1, N)
    assert jnp.allclose(out_no_xyz, features[:, :, None, :])

    print("KERNEL_OK")
</pallas_src>

<mosaic_0001>
module attributes {stable_mosaic.version = 11 : i64} {
  func.func @_group_all_kernel(%arg0: i32, %arg1: i32, %arg2: memref<1x3x384xf32, #tpu.memory_space<vmem>>, %arg3: memref<1x8x384xf32, #tpu.memory_space<vmem>>, %arg4: memref<1x11x384xf32, #tpu.memory_space<vmem>>) attributes {dimension_semantics = [#tpu.dimension_semantics<parallel>, #tpu.dimension_semantics<parallel>], iteration_bounds = array<i64: 2, 1>, scalar_prefetch = 0 : i64, scratch_operands = 0 : i64, tpu.core_type = #tpu.core_type<tc>, window_params = [{transform_indices = @transform_0, window_bounds = array<i64: 1, 3, 384>}, {transform_indices = @transform_1, window_bounds = array<i64: 1, 8, 384>}, {transform_indices = @transform_2, window_bounds = array<i64: 1, 11, 384>}]} {
    %c0 = arith.constant 0 : index
    %c0_0 = arith.constant 0 : index
    %c0_1 = arith.constant 0 : index
    %0 = vector.load %arg2[%c0, %c0_0, %c0_1] : memref<1x3x384xf32, #tpu.memory_space<vmem>>, vector<1x3x384xf32>
    %c0_2 = arith.constant 0 : index
    %c0_3 = arith.constant 0 : index
    %c0_4 = arith.constant 0 : index
    %1 = vector.load %arg4[%c0_2, %c0_3, %c0_4] : memref<1x11x384xf32, #tpu.memory_space<vmem>>, vector<1x3x384xf32>
    tpu.vector_store %arg4[%c0_2, %c0_3, %c0_4], %0 {strides = array<i32>} : memref<1x11x384xf32, #tpu.memory_space<vmem>>, vector<1x3x384xf32>,
    %c0_5 = arith.constant 0 : index
    %c0_6 = arith.constant 0 : index
    %c0_7 = arith.constant 0 : index
    %2 = vector.load %arg3[%c0_5, %c0_6, %c0_7] : memref<1x8x384xf32, #tpu.memory_space<vmem>>, vector<1x8x384xf32>
    %c0_8 = arith.constant 0 : index
    %c3 = arith.constant 3 : index
    %c0_9 = arith.constant 0 : index
    %3 = vector.load %arg4[%c0_8, %c3, %c0_9] : memref<1x11x384xf32, #tpu.memory_space<vmem>>, vector<1x8x384xf32>
    tpu.vector_store %arg4[%c0_8, %c3, %c0_9], %2 {strides = array<i32>} : memref<1x11x384xf32, #tpu.memory_space<vmem>>, vector<1x8x384xf32>,
    return
  }
  func.func @transform_0(%arg0: i32, %arg1: i32) -> (i32, i32, i32) {
    %c0_i32 = arith.constant 0 : i32
    %c0_i32_0 = arith.constant 0 : i32
    return %arg0, %c0_i32, %arg1 : i32, i32, i32
  }
  func.func @transform_1(%arg0: i32, %arg1: i32) -> (i32, i32, i32) {
    %c0_i32 = arith.constant 0 : i32
    %c0_i32_0 = arith.constant 0 : i32
    return %arg0, %c0_i32, %arg1 : i32, i32, i32
  }
  func.func @transform_2(%arg0: i32, %arg1: i32) -> (i32, i32, i32) {
    %c0_i32 = arith.constant 0 : i32
    %c0_i32_0 = arith.constant 0 : i32
    return %arg0, %c0_i32, %arg1 : i32, i32, i32
  }
}

</mosaic_0001>

<bundles_post_ra>
// kernel: tpu_custom_call.1
= control target key start
LH: loop header
LB: loop body
LE: loop exit
PB: predicated region body
PF: predicated region fallthrough
CT: control target
= control target key end

     0   :  { %7 = vsyncpa [#allocation3], 0  ;;  %s627_s0 = inlined_call_operand.vmem [shape: f32[2,3,384], index: 0, kind: input, shape index: {}]   ;;  %s628_s1 = inlined_call_operand.hbm [shape: f32[2,8,384], index: 1, kind: input, shape index: {}]   ;;  %s629_s2 = inlined_call_operand.vmem [shape: f32[2,11,384], index: 2, kind: output, shape index: {}]  }
   0x1   :  { %9 = vsyncpa [#allocation3 + $0x1], 0  ;;  %s542_s9 = smov 0   ;;  %s544_s10 = smov 0  }
   0x2   :  { %s546_s11 = smov 0   ;;  %s548_s12 = smov 0  }
   0x3   :  { %s550_s13 = smov 0   ;;  %s552_s14 = smov 0  }
   0x4 LB: > { %s375_s15 = sadd.s32 4294967295, %s525_s14   ;;  %s27_s16 = sadd.s32 1, %s521_s13  ;;  %s525_s14 = sphi %s552_s14, %s15_s14   ;;  %s521_s13 = sphi %s550_s13, %s635_s13   ;;  %s517_s12 = sphi %s548_s12, %s634_s12   ;;  %s513_s11 = sphi %s546_s11, %s633_s11   ;;  %s509_s10 = sphi %s544_s10, %s632_s10   ;;  %s505_s9 = sphi %s542_s9, %s631_s9  }
   0x5   : > { %p29_p0 = scmp.ge.s32.totalorder %s27_s16, 2  ;;  %s64_s17 = sadd.s32 1, %s513_s11 }
   0x6   : > { %p71_p1 = scmp.ne.s32.totalorder %s513_s11, %s509_s10  ;;  %p72_p2 = scmp.eq.s32.totalorder %s525_s14, 0 }
   0x7   : > { %s637_s16 = smov (%p29_p0, %s27_s16), 0  ;;  %p77_p4 = scmp.ne.s32.totalorder %s509_s10, %s505_s9 }
   0x8   : > { %p73_p3 = por %p72_p2, %p71_p1  ;;  %s59_s18 = ssub.s32 %s521_s13, %s637_s16 }
   0x9   : > { %p78_p5 = scmp.eq.s32.totalorder %s375_s15, 0  ;;  %p62_p6 = scmp.eq.s32.totalorder %s59_s18, 0 }
   0xa   : > { %p396_p8 = scmp.lt.s32.totalorder %s525_s14, 2  ;;  %s142_s21 = sand.u32 1, %s513_s11  }
   0xb   : > { %p581_p7 = por %p78_p5, %p77_p4  ;;  %s386_s22 = smul.u32 24, %s521_s13 }
   0xc   : > { %s587_s20 = scalar_select %p62_p6, %s513_s11, %s64_s17  }
   0xd   : > { %s385_s23 = smul.u32 24, %s142_s21  ;;  %s153_s26 = scalar_lea.hbm %s628_s1, %s386_s22 }
   0xe   : > { %p393_p9 = pnand %p396_p8, %p73_p3  ;;  %s155_s27 = sshll.u32 %s153_s26, 4  ;;  %s156_s27 = int_to_ptr.hbm [resolvable:$true] %s155_s27 }
   0xf   : > { %s146_s28 = scalar_lea.vmem [#allocation2], %s385_s23  ;;  %s143_s30 = scalar_lea.sflag [#allocation3], %s142_s21 }
  0x10   : > { %s157_s29 = sshll.u32 %s146_s28, 4  ;;  %p380_p10 = scmp.ge.s32.totalorder %s525_s14, 1  ;;  %s158_s29 = int_to_ptr.vmem [resolvable:$true] %s157_s29 }
  0x11   : > { %395 = dma.hbm_to_vmem [thread:$0]  (!%p393_p9), %s156_s27, 384, %s158_s29, %s143_s30  }
  0x12   : > { %p162_p11 = scmp.lt.s32.totalorder %s525_s14, 3 }
  0x14   : > { %p163_p12 = pnand %p380_p10, %p162_p11 }
  0x15   : > { %s168_s3 = sand.u32 (!%p163_p12), 1, %s509_s10  }
  0x16   : > { %166 = sbr.rel (%p163_p12) target bundleno = 47 (0x2f), region = 28  ;;  %s169_s5 = scalar_lea.sflag (!%p163_p12), [#allocation3], %s168_s3 }
  0x17   : > { %s387_s4 = smul.u32 (!%p163_p12), 24, %s168_s3 }
  0x19   : > { %s172_s6 = scalar_lea.vmem (!%p163_p12), [#allocation2], %s387_s4 }
  0x1b   : > { %500 = dma.done.wait (%p581_p7), %s169_s5, 384  }
  0x1c   : > { %502 = vsyncadd (%p581_p7), %s169_s5, 4294966912  ;;  %p208_p13 = scmp.lt.s32.totalorder %s517_s12, 1  ;;  %v244_v2 = vld [vmem:[%s172_s6] sm:$0xff]  ;;  %v245_v4 = vld [vmem:[%s172_s6 + $0x8] sm:$0xff] }
  0x1d   : > { %v250_v3 = vrot.slane %v244_v2, 5  ;;  %v246_v5 = vld [vmem:[%s172_s6 + $0x10] sm:$0xff]  ;;  %v251_v6 = vrot.slane %v245_v4, 5 }
  0x1e   : > { %s639_s12 = smov (!%p208_p13, %s517_s12), 1  ;;  %v252_v7 = vrot.slane %v246_v5, 5 }
  0x1f   : > { %s388_s7 = smul.u32 12, %s639_s12 }
  0x20   : > { %s389_s8 = smul.u32 48, %s639_s12 }
  0x21   : > { %s215_s17 = scalar_lea.vmem %s627_s0, %s388_s7 }
  0x22   : > { %s226_s22 = scalar_lea.vmem %s629_s2, %s389_s8  ;;  %v228_v0 = vld [vmem:[%s215_s17] sm:$0x77]  ;;  %v229_v1 = vld [vmem:[%s215_s17 + $0x8] sm:$0x7] }
  0x23   : > { %232 = vst [vmem:[#allocation1] ss:$2 sm:$0xff] %v228_v0 }
  0x24   : > { %234 = vst [vmem:[#allocation1 + $0x10] ss:$2 sm:$0xff] %v229_v1 }
  0x25   : > { %256 = vst [vmem:[%s226_s22] sm:$0xf8] %v250_v3 }
  0x26   : > { %259 = vst [vmem:[%s226_s22 + $0x18] sm:$0x7] %v250_v3 }
  0x27   : > { %257 = vst [vmem:[%s226_s22 + $0x8] sm:$0xf8] %v251_v6 }
  0x28   : > { %260 = vst [vmem:[%s226_s22 + $0x20] sm:$0x7] %v251_v6 }
  0x29   : > { %258 = vst [vmem:[%s226_s22 + $0x10] sm:$0xf8] %v252_v7 }
  0x2a   : > { %v235_v8 = vld.sshfl [vmem:[#allocation1] sm:$0xff pattern:$0x75316420]  ;;  %v236_v9 = vld.sshfl [vmem:[#allocation1 + $0x8] sm:$0xff pattern:$0x75316420] }
  0x2b   : > { %241 = vst [vmem:[%s226_s22] sm:$0x7] %v235_v8  ;;  %v237_v10 = vld.sshfl [vmem:[#allocation1 + $0x10] sm:$0xff pattern:$0x75316420] }
  0x2c   : > { %242 = vst [vmem:[%s226_s22 + $0x8] sm:$0x7] %v236_v9 }
  0x2d   : > { %243 = vst [vmem:[%s226_s22 + $0x10] sm:$0x7] %v237_v10 }
  0x2e   : > { %261 = vst [vmem:[%s226_s22 + $0x28] sm:$0x7] %v252_v7 }
  0x2f PF: > { %s15_s14 = sadd.s32 1, %s525_s14   ;;  %s631_s9 = smov %s509_s10 }
  0x30   : > { %p12_p0 = scmp.ge.s32.totalorder %s15_s14, 4   ;;  %s632_s10 = smov %s513_s11 }
  0x31   : > { %s633_s11 = smov %s587_s20  ;;  %s634_s12 = smov %s521_s13 }
  0x32   : > { %s635_s13 = smov %s637_s16  ;;  %14 = sbr.rel (!%p12_p0) target bundleno = 4 (0x4), region = 72 }
  0x37   :  { %292 = vsyncpa [#allocation3], 1 }
  0x38   :  { %294 = vsyncpa [#allocation3 + $0x1], 1 }

</bundles_post_ra>
